<compile_context>
chip_gen: v7x
topology: tpu7x:2x2x1
jax: 0.10.0
libtpu: 0.0.40
codegen_flags: <defaults>
</compile_context>

<pallas_src>
import jax
import jax.numpy as jnp
from jax.experimental import pallas as pl
from jax.experimental.pallas import tpu as pltpu


def _mil2_kernel(x_ref, w1_ref, b1_ref, w2_ref, b2_ref, o_ref):
    # x_ref : (TB*N, D)   flattened instances for this batch tile
    # w1_ref: (D, E)      first Linear weight (already transposed to D x E)
    # b1_ref: (1, E)      first Linear bias
    # w2_ref: (1, E)      second Linear weight (E -> 1), stored as a row
    # b2_ref: (1, 1)      second Linear bias (cancels in softmax, kept for fidelity)
    # o_ref : (TB, N)     attention weights per bag
    TB, N = o_ref.shape

    # First linear + tanh on the MXU / EUP: (TB*N, D) @ (D, E) -> (TB*N, E)
    h = jnp.tanh(
        jnp.dot(x_ref[...], w1_ref[...], preferred_element_type=jnp.float32)
        + b1_ref[...]
    )
    E = h.shape[-1]

    # Second linear (E -> 1) as broadcast-multiply + lane reduction.
    # reshape only splits the leading dim (minor dim unchanged) -> layout no-op.
    h3 = h.reshape(TB, N, E)                       # (TB, N, E)
    s = jnp.sum(h3 * w2_ref[...], axis=-1)         # (TB, N)
    s = s + b2_ref[...]                            # broadcast (1,1)

    # Softmax over the instance dim (original dim=-2 of (B, N, 1)).
    m = jnp.max(s, axis=-1, keepdims=True)
    e = jnp.exp(s - m)
    o_ref[...] = (e / jnp.sum(e, axis=-1, keepdims=True)).astype(o_ref.dtype)


def mil2_forward(x, w1, b1, w2, b2, *, block_b=None):
    """MIL2 forward.

    x : (B, N, D_in) float32
    w1: (D_in, E)    first Linear weight (transposed vs. torch layout)
    b1: (E,)         first Linear bias
    w2: (E,)         second Linear weight (E -> 1)
    b2: ()           second Linear bias
    returns (B, N) attention weights (softmax over N).
    """
    B, N, D = x.shape
    E = w1.shape[1]

    # Batch tile: keep the softmax group (one bag = N rows) inside one block.
    if block_b is None:
        block_b = B if B <= 8 else 8
    grid_b = pl.cdiv(B, block_b)

    # Lane-dense 2D view of the instances; reshape is free in the wrapper.
    x2 = x.reshape(B * N, D)
    b1_2 = b1.reshape(1, E)
    w2_2 = w2.reshape(1, E)
    b2_2 = jnp.reshape(b2, (1, 1)).astype(jnp.float32)

    return pl.pallas_call(
        _mil2_kernel,
        out_shape=jax.ShapeDtypeStruct((B, N), x.dtype),
        grid_spec=pltpu.PrefetchScalarGridSpec(
            num_scalar_prefetch=0,
            grid=(grid_b,),
            in_specs=[
                # one batch-tile of flattened instances per step
                pl.BlockSpec((block_b * N, D), lambda b: (b, 0)),
                # weights/biases: constant block index -> fetched once, resident
                pl.BlockSpec((D, E), lambda b: (0, 0)),
                pl.BlockSpec((1, E), lambda b: (0, 0)),
                pl.BlockSpec((1, E), lambda b: (0, 0)),
                pl.BlockSpec((1, 1), lambda b: (0, 0)),
            ],
            out_specs=pl.BlockSpec((block_b, N), lambda b: (b, 0)),
        ),
        compiler_params=pltpu.CompilerParams(
            dimension_semantics=("parallel",),
        ),
    )(x2, w1, b1_2, w2_2, b2_2)


if __name__ == "__main__":
    # Small shapes consistent with the module: batch=2, instances(seq)=8,
    # input_dim=32, embed_dim=16.
    B, N, D, E = 2, 8, 32, 16

    key = jax.random.PRNGKey(0)
    k1, k2, k3, k4, k5 = jax.random.split(key, 5)
    x = jax.random.normal(k1, (B, N, D), dtype=jnp.float32)
    w1 = jax.random.normal(k2, (D, E), dtype=jnp.float32) / jnp.sqrt(D)
    b1 = jax.random.normal(k3, (E,), dtype=jnp.float32) * 0.1
    w2 = jax.random.normal(k4, (E,), dtype=jnp.float32) / jnp.sqrt(E)
    b2 = (jax.random.normal(k5, (), dtype=jnp.float32) * 0.1)

    out = mil2_forward(x, w1, b1, w2, b2)
    out = jax.block_until_ready(out)

    # Pure-JAX reference matching the PyTorch module.
    h_ref = jnp.tanh(jnp.einsum("bnd,de->bne", x, w1) + b1)
    s_ref = jnp.einsum("bne,e->bn", h_ref, w2) + b2
    ref = jax.nn.softmax(s_ref, axis=-1)   # softmax over instance dim (orig dim=-2)

    assert out.shape == (B, N)
    assert jnp.allclose(out, ref, atol=1e-5, rtol=1e-5), "mismatch vs reference"
    # Rows sum to 1 (softmax sanity).
    assert jnp.allclose(jnp.sum(out, axis=-1), jnp.ones((B,)), atol=1e-5)

    print("KERNEL_OK")
</pallas_src>

<mosaic_0001>
module attributes {stable_mosaic.version = 11 : i64} {
  func.func @_mil2_kernel(%arg0: i32, %arg1: memref<16x32xf32, #tpu.memory_space<vmem>>, %arg2: memref<32x16xf32, #tpu.memory_space<vmem>>, %arg3: memref<1x16xf32, #tpu.memory_space<vmem>>, %arg4: memref<1x16xf32, #tpu.memory_space<vmem>>, %arg5: memref<1x1xf32, #tpu.memory_space<vmem>>, %arg6: memref<2x8xf32, #tpu.memory_space<vmem>>) attributes {dimension_semantics = [#tpu.dimension_semantics<parallel>], iteration_bounds = array<i64: 1>, scalar_prefetch = 0 : i64, scratch_operands = 0 : i64, tpu.core_type = #tpu.core_type<tc>, window_params = [{transform_indices = @transform_0, window_bounds = array<i64: 16, 32>}, {pipeline_mode = #tpu.pipeline_mode<synchronous>, transform_indices = @transform_1, window_bounds = array<i64: 32, 16>}, {pipeline_mode = #tpu.pipeline_mode<synchronous>, transform_indices = @transform_2, window_bounds = array<i64: 1, 16>}, {pipeline_mode = #tpu.pipeline_mode<synchronous>, transform_indices = @transform_3, window_bounds = array<i64: 1, 16>}, {pipeline_mode = #tpu.pipeline_mode<synchronous>, transform_indices = @transform_4, window_bounds = array<i64: 1, 1>}, {transform_indices = @transform_5, window_bounds = array<i64: 2, 8>}]} {
    %c0 = arith.constant 0 : index
    %c0_0 = arith.constant 0 : index
    %0 = vector.load %arg1[%c0, %c0_0] : memref<16x32xf32, #tpu.memory_space<vmem>>, vector<16x32xf32>
    %c0_1 = arith.constant 0 : index
    %c0_2 = arith.constant 0 : index
    %1 = vector.load %arg2[%c0_1, %c0_2] : memref<32x16xf32, #tpu.memory_space<vmem>>, vector<32x16xf32>
    %cst = arith.constant dense<0.000000e+00> : vector<16x16xf32>
    %2 = tpu.matmul %0, %1, %cst {dimension_numbers = #tpu.dot_dimension_numbers<[1], [0], [0], [1], [0, 0, 1, 1], [], []>} : vector<16x32xf32>, vector<32x16xf32>, vector<16x16xf32> -> vector<16x16xf32>
    %c0_3 = arith.constant 0 : index
    %c0_4 = arith.constant 0 : index
    %3 = vector.load %arg3[%c0_3, %c0_4] : memref<1x16xf32, #tpu.memory_space<vmem>>, vector<1x16xf32>
    %4 = vector.broadcast %3 : vector<1x16xf32> to vector<16x16xf32>
    %5 = arith.addf %2, %4 : vector<16x16xf32>
    %6 = math.tanh %5 : vector<16x16xf32>
    %7 = vector.shape_cast %6 : vector<16x16xf32> to vector<2x8x16xf32>
    %c0_5 = arith.constant 0 : index
    %c0_6 = arith.constant 0 : index
    %8 = vector.load %arg4[%c0_5, %c0_6] : memref<1x16xf32, #tpu.memory_space<vmem>>, vector<1x16xf32>
    %9 = vector.shape_cast %8 : vector<1x16xf32> to vector<1x1x16xf32>
    %10 = vector.broadcast %9 : vector<1x1x16xf32> to vector<2x8x16xf32>
    %11 = arith.mulf %7, %10 : vector<2x8x16xf32>
    %cst_7 = arith.constant dense<0.000000e+00> : vector<2x8xf32>
    %12 = vector.multi_reduction <add>, %11, %cst_7 [2] : vector<2x8x16xf32> to vector<2x8xf32>
    %c0_8 = arith.constant 0 : index
    %c0_9 = arith.constant 0 : index
    %13 = vector.load %arg5[%c0_8, %c0_9] : memref<1x1xf32, #tpu.memory_space<vmem>>, vector<1x1xf32>
    %14 = vector.broadcast %13 : vector<1x1xf32> to vector<2x8xf32>
    %15 = arith.addf %12, %14 : vector<2x8xf32>
    %cst_10 = arith.constant dense<0xFF800000> : vector<2xf32>
    %16 = vector.multi_reduction <maximumf>, %15, %cst_10 [1] : vector<2x8xf32> to vector<2xf32>
    %17 = vector.shape_cast %16 : vector<2xf32> to vector<2x1xf32>
    %18 = vector.broadcast %17 : vector<2x1xf32> to vector<2x8xf32>
    %19 = arith.subf %15, %18 : vector<2x8xf32>
    %20 = math.exp %19 : vector<2x8xf32>
    %cst_11 = arith.constant dense<0.000000e+00> : vector<2xf32>
    %21 = vector.multi_reduction <add>, %20, %cst_11 [1] : vector<2x8xf32> to vector<2xf32>
    %22 = vector.shape_cast %21 : vector<2xf32> to vector<2x1xf32>
    %23 = vector.broadcast %22 : vector<2x1xf32> to vector<2x8xf32>
    %24 = arith.divf %20, %23 : vector<2x8xf32>
    %c0_12 = arith.constant 0 : index
    %c0_13 = arith.constant 0 : index
    %25 = vector.load %arg6[%c0_12, %c0_13] : memref<2x8xf32, #tpu.memory_space<vmem>>, vector<2x8xf32>
    tpu.vector_store %arg6[%c0_12, %c0_13], %24 {strides = array<i32>} : memref<2x8xf32, #tpu.memory_space<vmem>>, vector<2x8xf32>,
    return
  }
  func.func @transform_0(%arg0: i32) -> (i32, i32) {
    %c0_i32 = arith.constant 0 : i32
    %c0_i32_0 = arith.constant 0 : i32
    return %arg0, %c0_i32 : i32, i32
  }
  func.func @transform_1(%arg0: i32) -> (i32, i32) {
    %c0_i32 = arith.constant 0 : i32
    %c0_i32_0 = arith.constant 0 : i32
    %c0_i32_1 = arith.constant 0 : i32
    return %c0_i32, %c0_i32_0 : i32, i32
  }
  func.func @transform_2(%arg0: i32) -> (i32, i32) {
    %c0_i32 = arith.constant 0 : i32
    %c0_i32_0 = arith.constant 0 : i32
    %c0_i32_1 = arith.constant 0 : i32
    return %c0_i32, %c0_i32_0 : i32, i32
  }
  func.func @transform_3(%arg0: i32) -> (i32, i32) {
    %c0_i32 = arith.constant 0 : i32
    %c0_i32_0 = arith.constant 0 : i32
    %c0_i32_1 = arith.constant 0 : i32
    return %c0_i32, %c0_i32_0 : i32, i32
  }
  func.func @transform_4(%arg0: i32) -> (i32, i32) {
    %c0_i32 = arith.constant 0 : i32
    %c0_i32_0 = arith.constant 0 : i32
    %c0_i32_1 = arith.constant 0 : i32
    return %c0_i32, %c0_i32_0 : i32, i32
  }
  func.func @transform_5(%arg0: i32) -> (i32, i32) {
    %c0_i32 = arith.constant 0 : i32
    %c0_i32_0 = arith.constant 0 : i32
    return %arg0, %c0_i32 : i32, i32
  }
}

</mosaic_0001>

<bundles_post_ra>
// kernel: tpu_custom_call.1
= control target key start
LH: loop header
LB: loop body
LE: loop exit
PB: predicated region body
PF: predicated region fallthrough
CT: control target
= control target key end

     0   :  { %s400_s0 = inlined_call_operand.vmem [shape: f32[16,32], index: 0, kind: input, shape index: {}]   ;;  %s401_s1 = inlined_call_operand.vmem [shape: f32[32,16], index: 1, kind: input, shape index: {}]   ;;  %s402_s2 = inlined_call_operand.vmem [shape: f32[1,16], index: 2, kind: input, shape index: {}]   ;;  %s403_s3 = inlined_call_operand.vmem [shape: f32[1,16], index: 3, kind: input, shape index: {}]   ;;  %s404_s4 = inlined_call_operand.<no memory space> [shape: f32[1,1], index: 4, kind: input, shape index: {}]   ;;  %s405_s5 = inlined_call_operand.hbm [shape: f32[2,8], index: 5, kind: output, shape index: {}]  }
   0x1   :  { %v10_v0 = vstv %s404_s4 }
   0x2   :  { %11 = vst [vmem:[#allocation2] sm:$0x1] %v10_v0 }
   0x3   :  { %v25_v1 = vld [vmem:[%s401_s1] sm:$0xff]  ;;  %v26_v2 = vld [vmem:[%s401_s1 + $0x8] sm:$0xff]  ;;  %v27_v3 = vld [vmem:[%s401_s1 + $0x10] sm:$0xff]  ;;  %vm36_vm0 = vcmask 261120  }
   0x4   :  { %v275_v4 = vpack.c.bf16 %v26_v2, %v25_v1  ;;  %v28_v5 = vld [vmem:[%s401_s1 + $0x18] sm:$0xff]  ;;  %v23_v6 = vld [vmem:[%s400_s0] sm:$0xff] }
   0x5   :  { %v279_v7 = vpack.c.bf16 %v28_v5, %v27_v3  ;;  %272 = vmatprep.mubr.msk.f32.mxu0 %vm36_vm0, %v23_v6 }
   0x6   :  { %12 = vsyncpa [#allocation4], 0  ;;  %276 = vmatprep.subr.bf16.mxu0 %v275_v4  ;;  %v24_v8 = vld [vmem:[%s400_s0 + $0x8] sm:$0xff]  ;;  %v323_v10 = vmov 0   ;;  %v253_v11 = vld [vmem:[%s402_s2] ss:$0 sm:$0xff]  ;;  %v150_v23 = vlaneseq }
   0x7   :  { %278 = vmatpush3.bf16.msra.mxu0 %v275_v4  ;;  %285 = vset.pattern.permute.xlu1 %v323_v10  ;;  %v256_v16 = vld [vmem:[%s403_s3] ss:$0 sm:$0xff]  ;;  %vm129_vm1 = vcmask 130048   ;;  %vm160_vm2 = vcmask 1041409   ;;  %vm163_vm3 = vcmask 58368   ;;  %s324_s0 = smov [#allocation3]  }
   0x8   :  { %280 = vmatprep.subr.bf16.mxu0 %v279_v7  ;;  %286 = vset.pattern.permute.xlu0 %v323_v10  ;;  %v151_v24 = vand.u32 127, %v150_v23  ;;  %v153_v25 = vshrl.u32 %v150_v23, 7  ;;  %s245_s2 = sshll.u32 %s324_s0, 4  ;;  %s246_s2 = int_to_ptr.vmem [resolvable:$true] %s245_s2 }
   0x9   :  { %v257_v9 = vld [vmem:[#allocation2] ss:$0 sm:$0xff]  ;;  %s299_s3 = scalar_lea.vmem %s246_s2, 32  ;;  %p304_p1 = scmp.lt.s32.totalorder %s246_s2, %s246_s2 }
   0xa   :  { %143 = vperm.xlu1 %285, %v257_v9   ;;  %v154_v28 = vsub.s32 %v151_v24, %v153_v25  ;;  %v170_v36 = vsub.s32 0, %v153_v25  ;;  %v174_v37 = vsub.s32 1, %v153_v25  ;;  %p300_p0 = scmp.ne.s32.totalorder %s246_s2, %s299_s3  ;;  %p305_p2 = scmp.lt.s32.totalorder %s299_s3, %s299_s3 }
   0xb   :  { %282 = vmatpush3.bf16.msra.mxu0 %v279_v7 }
   0xc   :  { %p306_p3 = por %p305_p2, %p304_p1 }
   0xe   :  { %273 = vmatmul.mubr.msk.f32.vlgmr.msra.gmra.mrb[0].mxu0 %vm36_vm0, %v24_v8  ;;  %p307_p4 = pnand %p306_p3, %p300_p0 }
  0x89   :  { %v144_v26 = vpop.permute.xlu1 %143 }
  0xe1   :  { %v274_v12 = vpop.f32.mrb[0].mxu0 }
  0xe2   :  { %v115_v13 = vadd.f32 %v274_v12, %v253_v11  ;;  %v109_v14 = vpop.f32.mrb[1].mxu0 }
  0xe3   :  { %v110_v15 = vadd.f32 %v253_v11, %v109_v14 }
  0xe4   :  { %287 = vtanh.f32 %v115_v13 }
  0xe5   :  { %289 = vtanh.f32 %v110_v15 }
  0xee   :  { %v288_v17 = vpop.eup %287 }
  0xef   :  { %v290_v18 = vpop.eup %289  ;;  %v128_v21 = vmul.f32 %v288_v17, %v256_v16 }
  0xf0   :  { %v127_v19 = vmul.f32 %v290_v18, %v256_v16 }
  0xf1   :  { %v133_v22 = vsel %vm129_vm1, %v128_v21, 0.0 }
  0xf2   :  { %v130_v20 = vsel %vm129_vm1, %v127_v19, 0.0 }
  0xf3   :  { %131 = vadd.xlane.f32.xlu0 %v130_v20 }
  0xf7   :  { %134 = vadd.xlane.f32.xlu0 %v133_v22 }
 0x180   :  { %v132_v27 = vpop.xlane.xlu0 %131 }
 0x181   :  { %v146_v29 = vadd.f32 %v144_v26, %v132_v27 }
 0x183   :  { %v155_v32 = vrot.slane %v146_v29, %v154_v28 }
 0x184   :  { %v135_v30 = vpop.xlane.xlu0 %134 }
 0x185   :  { %v147_v31 = vadd.f32 %v144_v26, %v135_v30 }
 0x187   :  { %v159_v33 = vrot.slane %v147_v31, %v154_v28 }
 0x189   :  { %v161_v34 = vsel %vm160_vm2, %v159_v33, %v155_v32 }
 0x18a   :  { %v164_v35 = vsel %vm163_vm3, %v161_v34, -inf }
 0x18b   :  { %165 = vmax.xlane.f32.xlu1 %v164_v35 }
 0x218   :  { %v166_v38 = vpop.xlane.xlu1 %165 }
 0x219   :  { %v171_v39 = vrot.slane %v166_v38, %v170_v36  ;;  %v175_v40 = vrot.slane %v166_v38, %v174_v37 }
 0x21b   :  { %v178_v41 = vsub.f32 %v146_v29, %v171_v39  ;;  %v179_v42 = vsub.f32 %v147_v31, %v175_v40 }
 0x21d   :  { %v180_v43 = vmul.f32 1.442695, %v178_v41  ;;  %v182_v44 = vmul.f32 1.442695, %v179_v42 }
 0x21f   :  { %291 = vpow2.f32 %v180_v43 }
 0x220   :  { %293 = vpow2.f32 %v182_v44 }
 0x229   :  { %v292_v45 = vpop.eup %291 }
 0x22a   :  { %v294_v46 = vpop.eup %293  ;;  %187 = vperm.xlu0 %286, %v292_v45  }
 0x22b   :  { %190 = vperm.xlu1 %285, %v294_v46  }
 0x2a9   :  { %v188_v47 = vpop.permute.xlu0 %187 }
 0x2aa   :  { %v191_v48 = vpop.permute.xlu1 %190  ;;  %v195_v49 = vrot.slane %v188_v47, %v154_v28 }
 0x2ab   :  { %v199_v50 = vrot.slane %v191_v48, %v154_v28 }
 0x2ad   :  { %v200_v51 = vsel %vm160_vm2, %v199_v50, %v195_v49 }
 0x2ae   :  { %v202_v52 = vsel %vm163_vm3, %v200_v51, 0.0 }
 0x2af   :  { %203 = vadd.xlane.f32.xlu0 %v202_v52 }
 0x33c   :  { %v204_v53 = vpop.xlane.xlu0 %203 }
 0x33d   :  { %v209_v54 = vrot.slane %v204_v53, %v170_v36  ;;  %v213_v55 = vrot.slane %v204_v53, %v174_v37 }
 0x33f   :  { %295 = vrcp.f32 %v209_v54 }
 0x340   :  { %297 = vrcp.f32 %v213_v55 }
 0x349   :  { %v296_v56 = vpop.eup %295 }
 0x34a   :  { %v217_v57 = vmul.f32 %v296_v56, %v292_v45  ;;  %v298_v58 = vpop.eup %297 }
 0x34b   :  { %v219_v59 = vmul.f32 %v298_v58, %v294_v46 }
 0x34c   :  { %223 = vperm.xlu1 %285, %v217_v57  }
 0x350   :  { %226 = vperm.xlu1 %285, %v219_v59  }
 0x3cb   :  { %v224_v60 = vpop.permute.xlu1 %223 }
 0x3cc   :  { %v231_v62 = vrot.slane %v224_v60, %v154_v28 }
 0x3cf   :  { %v227_v61 = vpop.permute.xlu1 %226 }
 0x3d0   :  { %v235_v63 = vrot.slane %v227_v61, %v154_v28 }
 0x3d2   :  { %v236_v0 = vsel %vm160_vm2, %v235_v63, %v231_v62 }
 0x3d3   :  { %238 = vst.msk [vmem:[#allocation3] sm:$0x3] %vm163_vm3, %v236_v0 }
 0x3d4   :  { %310 = shalt.err (!%p307_p4)
}
 0x3d5   :  { %s311_s11 = scalar_lea.hbm %s405_s5, 32 }
 0x3d6   :  { %p312_p5 = scmp.ne.s32.totalorder %s405_s5, %s311_s11  ;;  %p315_p6 = scmp.lt.u32.totalorder %s311_s11, %s405_s5 }
 0x3d8   :  { %p317_p7 = pnand %p315_p6, %p312_p5 }
 0x3da   :  { %320 = shalt.err (!%p317_p7)
}
 0x3db   :  { %248 = dma.vmem_to_hbm [thread:$0]  %s246_s2, 32, %s405_s5, [#allocation4]  }
 0x3dc   :  { %321 = dma.done.wait [#allocation4], 32  }
 0x3dd   :  { %322 = vsyncadd [#allocation4], 4294967264 }
 0x3de   :  { %252 = vsyncpa [#allocation4], 1 }

</bundles_post_ra>
